<compile_context>
chip_gen: v6e
topology: v6e:2x2x1
jax: 0.10.0
libtpu: 0.0.40
codegen_flags: <defaults>
</compile_context>

<pallas_src>
import jax
import jax.numpy as jnp
from jax.experimental import pallas as pl
from jax.experimental.pallas import tpu as pltpu


def _round_up(x, m):
    return ((x + m - 1) // m) * m


# ----------------------------- Pallas kernel --------------------------------
def _prefix_mlp_kernel(x_ref, w1_ref, b1_ref, w2_ref, b2_ref, o_ref, h_ref):
    # x_ref:  (tm, H)      bf16
    # w1_ref: (H, Pp)      bf16     b1_ref: (1, Pp)      f32
    # w2_ref: (Pp, tn)     bf16     b2_ref: (1, tn)      f32
    # o_ref:  (tm, tn)     f32      h_ref:  (tm, Pp)     bf16 scratch
    j = pl.program_id(1)

    # First matmul + tanh only once per row tile; reuse the cached h for every
    # column slab of the (much wider) second matmul.
    @pl.when(j == 0)
    def _():
        h = jnp.dot(x_ref[...], w1_ref[...],
                    preferred_element_type=jnp.float32)      # f32 accumulate
        h = jnp.tanh(h + b1_ref[...])                         # f32 bias + tanh
        h_ref[...] = h.astype(h_ref.dtype)

    o = jnp.dot(h_ref[...], w2_ref[...],
                preferred_element_type=jnp.float32) + b2_ref[...]
    o_ref[...] = o.astype(o_ref.dtype)


def prefix_mlp_pallas(x, w1, b1, w2, b2, *, tile_rows=None, tile_cols=None,
                      compute_dtype=jnp.bfloat16):
    """x: [N, H] rows -> [N, L*2*H] via Linear->tanh->Linear (the `trans` MLP)."""
    n, h_dim = x.shape
    p = w1.shape[1]
    out_dim = w2.shape[1]
    out_dtype = x.dtype

    # Pad the K dim of the dominant matmul (P) to a lane multiple of 128.
    # Exact: padded W1 cols / b1 entries / W2 rows are zero.
    p_pad = _round_up(p, 128)
    if p_pad != p:
        w1 = jnp.pad(w1, ((0, 0), (0, p_pad - p)))
        b1 = jnp.pad(b1, ((0, 0), (0, p_pad - p)))
        w2 = jnp.pad(w2, ((0, p_pad - p), (0, 0)))

    # Row tile: one grid step for small N, else large (amortize per-step cost,
    # feed the MXU M dim).  Must be a multiple of 8.
    if tile_rows is None:
        tile_rows = min(512, _round_up(n, 8))
    # Column tile over out_dim: full width when small, else a 128-aligned slab
    # (lane-dense unmasked stores; keeps the W2 tile small enough for v7x's
    # 64 MiB VMEM).
    if tile_cols is None:
        tile_cols = out_dim if out_dim <= 2048 else 1024

    # bf16 MXU inputs, f32 accumulation / bias / tanh, f32 output.
    x = x.astype(compute_dtype)
    w1 = w1.astype(compute_dtype)
    w2 = w2.astype(compute_dtype)
    b1 = b1.astype(jnp.float32)
    b2 = b2.astype(jnp.float32)

    grid = (pl.cdiv(n, tile_rows), pl.cdiv(out_dim, tile_cols))

    return pl.pallas_call(
        _prefix_mlp_kernel,
        out_shape=jax.ShapeDtypeStruct((n, out_dim), out_dtype),
        grid_spec=pltpu.PrefetchScalarGridSpec(
            num_scalar_prefetch=0,
            grid=grid,
            in_specs=[
                pl.BlockSpec((tile_rows, h_dim), lambda i, j: (i, 0)),   # x rows
                pl.BlockSpec((h_dim, p_pad), lambda i, j: (0, 0)),       # W1 (resident)
                pl.BlockSpec((1, p_pad), lambda i, j: (0, 0)),           # b1
                pl.BlockSpec((p_pad, tile_cols), lambda i, j: (0, j)),   # W2 column slab
                pl.BlockSpec((1, tile_cols), lambda i, j: (0, j)),       # b2 column slab
            ],
            out_specs=pl.BlockSpec((tile_rows, tile_cols), lambda i, j: (i, j)),
            scratch_shapes=[pltpu.VMEM((tile_rows, p_pad), compute_dtype)],  # cached h
        ),
        compiler_params=pltpu.CompilerParams(
            # rows shard across TCs (v7x); cols are "arbitrary" because of the
            # cached-h scratch dependence within a row tile.
            dimension_semantics=("parallel", "arbitrary"),
            vmem_limit_bytes=48 * 1024 * 1024,  # > v5e/v6e default, headroom on v7x
        ),
    )(x, w1, b1, w2, b2)


# ------------------------- module forward (JAX glue) -------------------------
def prefix_cross_attention_encoder_forward(params, prefix, graph_prefix, cfg):
    """
    prefix:       [B, S]  int32 token ids (S == pre_seq_len)
    graph_prefix: [B, GS, GL, n_embd]
    returns:      [B, pre_seq_len, num_hidden_layers * 2 * hidden_size]
    """
    B, S = prefix.shape
    Bg, GS, GL, ne = graph_prefix.shape
    H = cfg["hidden_size"]
    L = cfg["num_hidden_layers"]
    n_head = cfg["num_attention_heads"]
    n_embd = H // n_head
    assert ne == n_embd and Bg == B

    # torch.cat([graph_prefix]*(2*n_head), dim=3)  ==  tile along last dim.
    # Do it as a broadcast + reshape (no 2*n_head-way concat in the HLO).
    graph_key_values = jnp.broadcast_to(
        graph_prefix[:, :, :, None, :], (B, GS, GL, 2 * n_head, n_embd)
    ).reshape(B, GS, GL, 2 * H)

    if cfg["prefix_projection"]:
        # TODO(synk): embedding gather could be fused via scalar-prefetch +
        # pl.Element row index_map; kept as an XLA gather for simplicity.
        prefix_tokens = jnp.take(params["embedding"], prefix, axis=0)       # [B, S, H]
        x = prefix_tokens.reshape(B * S, H)
        pkv = prefix_mlp_pallas(x, params["w1"], params["b1"],
                                params["w2"], params["b2"])                 # [B*S, L*2*H]
        prefix_key_values = pkv.reshape(B, S, L * 2 * H)
    else:
        prefix_key_values = jnp.take(params["embedding"], prefix, axis=0)   # [B, S, L*2*H]

    pkv4 = prefix_key_values.reshape(B, S, L, 2 * H)

    # Splice in the graph prefix (pure indexing / concat, stays in XLA).
    p = pkv4[:, : S - GS, :, :]                            # [B, S-GS, L,    2H]
    s = pkv4[:, S - GS:, :, :]                             # [B, GS,   L,    2H]
    s = s[:, :, : L - GL, :]                               # [B, GS,   L-GL, 2H]
    s = jnp.concatenate([s, graph_key_values], axis=2)     # [B, GS,   L,    2H]
    past = jnp.concatenate([p, s], axis=1)                 # [B, S,    L,    2H]
    past = past.reshape(-1, cfg["pre_seq_len"], L * 2 * H)
    return past


# ------------------------------ pure-JAX reference ---------------------------
def _mlp_reference(x, w1, b1, w2, b2):
    # Same bf16-input / f32-accumulate recipe as the kernel, for validation.
    xb = x.astype(jnp.bfloat16)
    h = jnp.dot(xb, w1.astype(jnp.bfloat16),
                preferred_element_type=jnp.float32) + b1
    h = jnp.tanh(h).astype(jnp.bfloat16)
    o = jnp.dot(h, w2.astype(jnp.bfloat16),
                preferred_element_type=jnp.float32) + b2
    return o.astype(x.dtype)


# --------------------------------- main --------------------------------------
if __name__ == "__main__":
    cfg = dict(
        prefix_projection=True,
        num_hidden_layers=4,
        hidden_size=32,
        num_attention_heads=4,
        pre_seq_len=8,
        prefix_hidden_size=64,
    )
    B = 2
    S = cfg["pre_seq_len"]
    H = cfg["hidden_size"]
    L = cfg["num_hidden_layers"]
    P = cfg["prefix_hidden_size"]
    n_embd = H // cfg["num_attention_heads"]
    GS, GL = 4, 2                         # graph_seq_len <= S, graph_layers <= L

    key = jax.random.PRNGKey(0)
    k_emb, k_w1, k_b1, k_w2, k_b2, k_pref, k_graph = jax.random.split(key, 7)

    params = {
        "embedding": jax.random.normal(k_emb, (cfg["pre_seq_len"], H), jnp.float32) * 0.02,
        "w1": jax.random.normal(k_w1, (H, P), jnp.float32) * 0.02,
        "b1": jax.random.normal(k_b1, (1, P), jnp.float32) * 0.02,
        "w2": jax.random.normal(k_w2, (P, L * 2 * H), jnp.float32) * 0.02,
        "b2": jax.random.normal(k_b2, (1, L * 2 * H), jnp.float32) * 0.02,
    }

    prefix = jax.random.randint(k_pref, (B, S), 0, cfg["pre_seq_len"], jnp.int32)
    graph_prefix = jax.random.normal(k_graph, (B, GS, GL, n_embd), jnp.float32)

    out = prefix_cross_attention_encoder_forward(params, prefix, graph_prefix, cfg)
    out = jax.block_until_ready(out)
    assert out.shape == (B, cfg["pre_seq_len"], L * 2 * H), out.shape

    # Sanity-check the Pallas MLP against a pure-JAX reference (same dtypes).
    x_ref_in = jnp.take(params["embedding"], prefix, axis=0).reshape(B * S, H)
    got = prefix_mlp_pallas(x_ref_in, params["w1"], params["b1"],
                            params["w2"], params["b2"])
    want = _mlp_reference(x_ref_in, params["w1"], params["b1"],
                          params["w2"], params["b2"])
    got = jax.block_until_ready(got)
    assert jnp.allclose(got, want, rtol=1e-2, atol=1e-3), \
        float(jnp.max(jnp.abs(got - want)))

    print("KERNEL_OK")
</pallas_src>

<mosaic_0001>
module attributes {stable_mosaic.version = 11 : i64} {
  func.func @_prefix_mlp_kernel(%arg0: i32, %arg1: i32, %arg2: memref<16x32xbf16, #tpu.memory_space<vmem>>, %arg3: memref<32x128xbf16, #tpu.memory_space<vmem>>, %arg4: memref<1x128xf32, #tpu.memory_space<vmem>>, %arg5: memref<128x256xbf16, #tpu.memory_space<vmem>>, %arg6: memref<1x256xf32, #tpu.memory_space<vmem>>, %arg7: memref<16x256xf32, #tpu.memory_space<vmem>>, %arg8: memref<16x128xbf16, #tpu.memory_space<vmem>>) attributes {dimension_semantics = [#tpu.dimension_semantics<parallel>, #tpu.dimension_semantics<arbitrary>], iteration_bounds = array<i64: 1, 1>, scalar_prefetch = 0 : i64, scratch_operands = 1 : i64, tpu.core_type = #tpu.core_type<tc>, window_params = [{transform_indices = @transform_0, window_bounds = array<i64: 16, 32>}, {pipeline_mode = #tpu.pipeline_mode<synchronous>, transform_indices = @transform_1, window_bounds = array<i64: 32, 128>}, {pipeline_mode = #tpu.pipeline_mode<synchronous>, transform_indices = @transform_2, window_bounds = array<i64: 1, 128>}, {transform_indices = @transform_3, window_bounds = array<i64: 128, 256>}, {transform_indices = @transform_4, window_bounds = array<i64: 1, 256>}, {transform_indices = @transform_5, window_bounds = array<i64: 16, 256>}]} {
    %c0_i32 = arith.constant 0 : i32
    %0 = arith.cmpi eq, %arg1, %c0_i32 : i32
    %1 = arith.extui %0 : i1 to i32
    %c0_i32_0 = arith.constant 0 : i32
    %2 = arith.cmpi ne, %1, %c0_i32_0 : i32
    scf.if %2 {
      %c0_8 = arith.constant 0 : index
      %c0_9 = arith.constant 0 : index
      %10 = vector.load %arg2[%c0_8, %c0_9] : memref<16x32xbf16, #tpu.memory_space<vmem>>, vector<16x32xbf16>
      %c0_10 = arith.constant 0 : index
      %c0_11 = arith.constant 0 : index
      %11 = vector.load %arg3[%c0_10, %c0_11] : memref<32x128xbf16, #tpu.memory_space<vmem>>, vector<32x128xbf16>
      %cst_12 = arith.constant dense<0.000000e+00> : vector<16x128xf32>
      %12 = tpu.matmul %10, %11, %cst_12 {dimension_numbers = #tpu.dot_dimension_numbers<[1], [0], [0], [1], [0, 0, 1, 1], [], []>} : vector<16x32xbf16>, vector<32x128xbf16>, vector<16x128xf32> -> vector<16x128xf32>
      %c0_13 = arith.constant 0 : index
      %c0_14 = arith.constant 0 : index
      %13 = vector.load %arg4[%c0_13, %c0_14] : memref<1x128xf32, #tpu.memory_space<vmem>>, vector<1x128xf32>
      %14 = vector.broadcast %13 : vector<1x128xf32> to vector<16x128xf32>
      %15 = arith.addf %12, %14 : vector<16x128xf32>
      %16 = math.tanh %15 : vector<16x128xf32>
      %17 = arith.truncf %16 : vector<16x128xf32> to vector<16x128xbf16>
      %c0_15 = arith.constant 0 : index
      %c0_16 = arith.constant 0 : index
      %18 = vector.load %arg8[%c0_15, %c0_16] : memref<16x128xbf16, #tpu.memory_space<vmem>>, vector<16x128xbf16>
      tpu.vector_store %arg8[%c0_15, %c0_16], %17 {strides = array<i32>} : memref<16x128xbf16, #tpu.memory_space<vmem>>, vector<16x128xbf16>,
    } else {
    }
    %c0 = arith.constant 0 : index
    %c0_1 = arith.constant 0 : index
    %3 = vector.load %arg8[%c0, %c0_1] : memref<16x128xbf16, #tpu.memory_space<vmem>>, vector<16x128xbf16>
    %c0_2 = arith.constant 0 : index
    %c0_3 = arith.constant 0 : index
    %4 = vector.load %arg5[%c0_2, %c0_3] : memref<128x256xbf16, #tpu.memory_space<vmem>>, vector<128x256xbf16>
    %cst = arith.constant dense<0.000000e+00> : vector<16x256xf32>
    %5 = tpu.matmul %3, %4, %cst {dimension_numbers = #tpu.dot_dimension_numbers<[1], [0], [0], [1], [0, 0, 1, 1], [], []>} : vector<16x128xbf16>, vector<128x256xbf16>, vector<16x256xf32> -> vector<16x256xf32>
    %c0_4 = arith.constant 0 : index
    %c0_5 = arith.constant 0 : index
    %6 = vector.load %arg6[%c0_4, %c0_5] : memref<1x256xf32, #tpu.memory_space<vmem>>, vector<1x256xf32>
    %7 = vector.broadcast %6 : vector<1x256xf32> to vector<16x256xf32>
    %8 = arith.addf %5, %7 : vector<16x256xf32>
    %c0_6 = arith.constant 0 : index
    %c0_7 = arith.constant 0 : index
    %9 = vector.load %arg7[%c0_6, %c0_7] : memref<16x256xf32, #tpu.memory_space<vmem>>, vector<16x256xf32>
    tpu.vector_store %arg7[%c0_6, %c0_7], %8 {strides = array<i32>} : memref<16x256xf32, #tpu.memory_space<vmem>>, vector<16x256xf32>,
    return
  }
  func.func @transform_0(%arg0: i32, %arg1: i32) -> (i32, i32) {
    %c0_i32 = arith.constant 0 : i32
    %c0_i32_0 = arith.constant 0 : i32
    return %arg0, %c0_i32 : i32, i32
  }
  func.func @transform_1(%arg0: i32, %arg1: i32) -> (i32, i32) {
    %c0_i32 = arith.constant 0 : i32
    %c0_i32_0 = arith.constant 0 : i32
    %c0_i32_1 = arith.constant 0 : i32
    return %c0_i32, %c0_i32_0 : i32, i32
  }
  func.func @transform_2(%arg0: i32, %arg1: i32) -> (i32, i32) {
    %c0_i32 = arith.constant 0 : i32
    %c0_i32_0 = arith.constant 0 : i32
    %c0_i32_1 = arith.constant 0 : i32
    return %c0_i32, %c0_i32_0 : i32, i32
  }
  func.func @transform_3(%arg0: i32, %arg1: i32) -> (i32, i32) {
    %c0_i32 = arith.constant 0 : i32
    %c0_i32_0 = arith.constant 0 : i32
    return %c0_i32, %arg1 : i32, i32
  }
  func.func @transform_4(%arg0: i32, %arg1: i32) -> (i32, i32) {
    %c0_i32 = arith.constant 0 : i32
    %c0_i32_0 = arith.constant 0 : i32
    return %c0_i32, %arg1 : i32, i32
  }
  func.func @transform_5(%arg0: i32, %arg1: i32) -> (i32, i32) {
    %c0_i32 = arith.constant 0 : i32
    return %arg0, %arg1 : i32, i32
  }
}

</mosaic_0001>

<bundles_post_ra>
// kernel: tpu_custom_call.1
= control target key start
LH: loop header
LB: loop body
LE: loop exit
PB: predicated region body
PF: predicated region fallthrough
CT: control target
= control target key end

     0   :  { %10 = vsyncpa [#allocation4], 0  ;;  %s569_s0 = inlined_call_operand.hbm [shape: bf16[16,32], index: 0, kind: input, shape index: {}]   ;;  %s570_s1 = inlined_call_operand.hbm [shape: bf16[32,128], index: 1, kind: input, shape index: {}]   ;;  %s571_s2 = inlined_call_operand.vmem [shape: f32[1,128], index: 2, kind: input, shape index: {}]   ;;  %s572_s3 = inlined_call_operand.hbm [shape: bf16[128,256], index: 3, kind: input, shape index: {}]   ;;  %s573_s4 = inlined_call_operand.vmem [shape: f32[1,256], index: 4, kind: input, shape index: {}]   ;;  %s574_s5 = inlined_call_operand.hbm [shape: f32[16,256], index: 5, kind: output, shape index: {}]  }
   0x1   :  { %11 = vsyncpa [#allocation7], 0 }
   0x2   :  { %12 = vsyncpa [#allocation5], 0  ;;  %s508_s18 = smov [#allocation6]   ;;  %s509_s20 = smov [#allocation3]  }
   0x3   :  { %s30_s19 = sshll.u32 %s508_s18, 4  ;;  %s18_s21 = sshll.u32 %s509_s20, 4  ;;  %s31_s19 = int_to_ptr.vmem [resolvable:$true] %s30_s19  ;;  %s19_s21 = int_to_ptr.vmem [resolvable:$true] %s18_s21 }
   0x4   :  { %s430_s22 = scalar_lea.vmem %s31_s19, 256  ;;  %p435_p1 = scmp.lt.s32.totalorder %s31_s19, %s31_s19 }
   0x5   :  { %p431_p0 = scmp.ne.s32.totalorder %s31_s19, %s430_s22  ;;  %p436_p2 = scmp.lt.s32.totalorder %s430_s22, %s430_s22 }
   0x7   :  { %p437_p3 = por %p436_p2, %p435_p1 }
   0x9   :  { %p438_p4 = pnand %p437_p3, %p431_p0 }
   0xb   :  { %441 = shalt.err (!%p438_p4)
}
   0xc   :  { %s510_s23 = smov 64   ;;  %s511_s24 = smov 4  }
   0xd   :  { %36 = dma.hbm_to_vmem [thread:$0]  %s570_s1, 256, %s31_s19, [#allocation7], %s510_s23, %s510_s23, %s511_s24  }
   0xe   :  { %s450_s27 = scalar_lea.vmem %s19_s21, 128  ;;  %p455_p6 = scmp.lt.s32.totalorder %s19_s21, %s19_s21 }
   0xf   :  { %p451_p5 = scmp.ne.s32.totalorder %s19_s21, %s450_s27  ;;  %p456_p7 = scmp.lt.s32.totalorder %s450_s27, %s450_s27 }
  0x11   :  { %p457_p8 = por %p456_p7, %p455_p6 }
  0x13   :  { %p458_p9 = pnand %p457_p8, %p451_p5 }
  0x15   :  { %461 = shalt.err (!%p458_p9)
}
  0x16   :  { %24 = dma.hbm_to_vmem [thread:$0]  %s569_s0, 128, %s19_s21, [#allocation4], %s510_s23, %s510_s23, %s511_s24  }
  0x17   :  { %s512_s30 = smov [#allocation8]  }
  0x18   :  { %s44_s6 = sshll.u32 %s512_s30, 4  ;;  %s45_s6 = int_to_ptr.vmem [resolvable:$true] %s44_s6 }
  0x19   :  { %s470_s7 = scalar_lea.vmem %s45_s6, 2048  ;;  %p475_p11 = scmp.lt.s32.totalorder %s45_s6, %s45_s6 }
  0x1a   :  { %p471_p10 = scmp.ne.s32.totalorder %s45_s6, %s470_s7  ;;  %p476_p12 = scmp.lt.s32.totalorder %s470_s7, %s470_s7 }
  0x1c   :  { %p477_p13 = por %p476_p12, %p475_p11 }
  0x1e   :  { %p478_p0 = pnand %p477_p13, %p471_p10 }
  0x20   :  { %481 = shalt.err (!%p478_p0)
}
  0x21   :  { %s513_s1 = smov 128   ;;  %s514_s8 = smov 8  }
  0x22   :  { %50 = dma.hbm_to_vmem [thread:$0]  %s572_s3, 2048, %s45_s6, [#allocation7], %s513_s1, %s513_s1, %s514_s8  }
  0x23   :  { %502 = dma.done.wait [#allocation4], 128  }
  0x24   :  { %503 = vsyncadd [#allocation4], 4294967168 }
  0x25   :  { %504 = dma.done.wait [#allocation7], 2304  }
  0x26   :  { %505 = vsyncadd [#allocation7], 4294964992  ;;  %v515_v0 = vmov 0.0   ;;  %vm516_vm0 = vmmov 0   ;;  %v390_v1 = vld [vmem:[#allocation6 + $0x8] sm:$0xff]   ;;  %v391_v2 = vld [vmem:[#allocation6] sm:$0xff]   ;;  %v174_v32 = vlaneseq }
  0x27   :  { %369 = vmatprep.subr.bf16.mxu0 %v515_v0  ;;  %373 = vmatprep.mubr.msk.bf16.mxu0 %vm516_vm0, %v515_v0  ;;  %v392_v3 = vld [vmem:[#allocation3] sm:$0xff]   ;;  %vm97_vm1 = vcmask 261120   ;;  %v393_v4 = vld [vmem:[#allocation8 + $0x74] ss:$8 sps:$4 sm:$0xff]   ;;  %v395_v5 = vld [vmem:[#allocation8 + $0x70] ss:$8 sps:$4 sm:$0xff]  }
  0x28   :  { %370 = vmatpush3.bf16.msra.mxu0 %v390_v1  ;;  %270 = vmatprep.subr.bf16.mxu1 %v393_v4  ;;  %v396_v6 = vld [vmem:[#allocation8 + $0x64] ss:$8 sps:$4 sm:$0xff]   ;;  %v398_v7 = vld [vmem:[#allocation8 + $0x60] ss:$8 sps:$4 sm:$0xff]   ;;  %v399_v8 = vld [vmem:[#allocation8 + $0x54] ss:$8 sps:$4 sm:$0xff]  }
  0x29   :  { %371 = vmatprep.subr.bf16.mxu0 %v515_v0  ;;  %271 = vmatpush1.bf16.msra.mxu1 %v395_v5  ;;  %v401_v9 = vld [vmem:[#allocation8 + $0x50] ss:$8 sps:$4 sm:$0xff]   ;;  %v402_v10 = vld [vmem:[#allocation8 + $0x44] ss:$8 sps:$4 sm:$0xff]   ;;  %v404_v11 = vld [vmem:[#allocation8 + $0x40] ss:$8 sps:$4 sm:$0xff]  }
  0x2a   :  { %272 = vmatprep.subr.bf16.mxu1 %v396_v6  ;;  %v405_v12 = vld [vmem:[#allocation8 + $0x34] ss:$8 sps:$4 sm:$0xff]   ;;  %v407_v13 = vld [vmem:[#allocation8 + $0x30] ss:$8 sps:$4 sm:$0xff]   ;;  %v408_v14 = vld [vmem:[#allocation8 + $0x24] ss:$8 sps:$4 sm:$0xff]  }
  0x2b   :  { %v410_v15 = vld [vmem:[#allocation8 + $0x20] ss:$8 sps:$4 sm:$0xff]   ;;  %v411_v16 = vld [vmem:[#allocation8 + $0x14] ss:$8 sps:$4 sm:$0xff]   ;;  %v413_v17 = vld [vmem:[#allocation8 + $0x10] ss:$8 sps:$4 sm:$0xff]  }
  0x2c   :  { %372 = vmatpush3.bf16.msra.mxu0 %v391_v2  ;;  %v414_v18 = vld [vmem:[#allocation8 + $0x4] ss:$8 sps:$4 sm:$0xff]   ;;  %v416_v19 = vld [vmem:[#allocation8] ss:$8 sps:$4 sm:$0xff]   ;;  %v517_v20 = vmov 0   ;;  %v175_v33 = vshrl.u32 %v174_v32, 7 }
  0x2d   :  { %273 = vmatpush1.bf16.msra.mxu1 %v398_v7  ;;  %302 = vmatprep.mubr.bf16.mxu1 %v517_v20  ;;  %v335_v21 = vld [vmem:[%s571_s2] ss:$0 sm:$0xff]  ;;  %s518_s2 = smov [#allocation9]  }
  0x2e   :  { %274 = vmatprep.subr.bf16.mxu1 %v399_v8  ;;  %v176_v34 = vsub.s32 0, %v175_v33  ;;  %v172_v35 = vld [vmem:[%s573_s4] sm:$0x3]  ;;  %v180_v36 = vsub.s32 1, %v175_v33  ;;  %s322_s13 = sshll.u32 %s518_s2, 4  ;;  %s323_s13 = int_to_ptr.vmem [resolvable:$true] %s322_s13 }
  0x2f   :  { %374 = vmatmul.mubr.msk.bf16.vlgmr.msra.gmra.mxu0 %vm97_vm1, %v392_v3  ;;  %s482_s14 = scalar_lea.vmem %s323_s13, 512  ;;  %p487_p2 = scmp.lt.s32.totalorder %s323_s13, %s323_s13 }
  0x30   :  { %v177_v37 = vrot.slane %v172_v35, %v176_v34  ;;  %v181_v38 = vrot.slane %v172_v35, %v180_v36  ;;  %p483_p1 = scmp.ne.s32.totalorder %s323_s13, %s482_s14  ;;  %p488_p3 = scmp.lt.s32.totalorder %s482_s14, %s482_s14 }
  0x31   :  { %275 = vmatpush1.bf16.msra.mxu1 %v401_v9 }
  0x32   :  { %276 = vmatprep.subr.bf16.mxu1 %v402_v10  ;;  %p489_p4 = por %p488_p3, %p487_p2 }
  0x34   :  { %p490_p5 = pnand %p489_p4, %p483_p1 }
  0x35   :  { %277 = vmatpush1.bf16.msra.mxu1 %v404_v11 }
  0x36   :  { %278 = vmatprep.subr.bf16.mxu1 %v405_v12 }
  0x39   :  { %279 = vmatpush1.bf16.msra.mxu1 %v407_v13 }
  0x3a   :  { %280 = vmatprep.subr.bf16.mxu1 %v408_v14 }
  0x3d   :  { %281 = vmatpush1.bf16.msra.mxu1 %v410_v15 }
  0x3e   :  { %282 = vmatprep.subr.bf16.mxu1 %v411_v16 }
  0x41   :  { %283 = vmatpush1.bf16.msra.mxu1 %v413_v17 }
  0x42   :  { %284 = vmatprep.subr.bf16.mxu1 %v414_v18 }
  0x45   :  { %285 = vmatpush1.bf16.msra.mxu1 %v416_v19 }
  0xef   :  { %v135_v22 = vpop.f32.mrf.mxu0 }
  0xf0   :  { %v136_v23 = vadd.f32 %v335_v21, %v135_v22 }
  0xf1   :  { %v375_v24 = vpop.f32.mrf.mxu0 }
  0xf2   :  { %418 = vtanh.f32 %v136_v23 }
  0xf3   :  { %v138_v25 = vpop.f32.mrf.mxu0 }
  0xf4   :  { %v139_v26 = vadd.f32 %v335_v21, %v138_v25 }
  0xf5   :  { %v376_v27 = vpop.f32.mrf.mxu0 }
  0xf6   :  { %420 = vtanh.f32 %v139_v26 }
  0xff   :  { %v419_v28 = vpop.eup %418 }
 0x103   :  { %v421_v29 = vpop.eup %420 }
 0x104   :  { %v364_v30 = vpack.c.bf16 %v421_v29, %v419_v28 }
 0x106   :  { %365 = vst [vmem:[#allocation2] sm:$0xff] %v364_v30  }
 0x10d   :  { %v417_v31 = vld [vmem:[#allocation2] sm:$0xff]  }
 0x10e   :  { %303 = vmatmul.mubr.bf16.vlgmr.msra.gmra.mxu1 %v417_v31 }
 0x1ce   :  { %v304_v39 = vpop.f32.mrf.mxu1 }
 0x1cf   :  { %v305_v40 = vadd.f32 %v304_v39, %v177_v37 }
 0x1d0   :  { %v306_v41 = vpop.f32.mrf.mxu1 }
 0x1d1   :  { %313 = vst [vmem:[#allocation9] sm:$0xff] %v305_v40  ;;  %v307_v42 = vadd.f32 %v306_v41, %v181_v38 }
 0x1d2   :  { %v308_v43 = vpop.f32.mrf.mxu1 }
 0x1d3   :  { %314 = vst [vmem:[#allocation9 + $0x8] sm:$0xff] %v307_v42  ;;  %v309_v44 = vadd.f32 %v308_v43, %v177_v37 }
 0x1d4   :  { %v310_v45 = vpop.f32.mrf.mxu1 }
 0x1d5   :  { %315 = vst [vmem:[#allocation9 + $0x10] sm:$0xff] %v309_v44  ;;  %v311_v46 = vadd.f32 %v310_v45, %v181_v38 }
 0x1d7   :  { %316 = vst [vmem:[#allocation9 + $0x18] sm:$0xff] %v311_v46 }
 0x1d8   :  { %493 = shalt.err (!%p490_p5)
}
 0x1d9   :  { %s519_s4 = smov 256   ;;  %s520_s15 = smov 16  }
 0x1da   :  { %328 = dma.vmem_to_hbm [thread:$0]  %s323_s13, 512, %s574_s5, [#allocation5], %s519_s4, %s519_s4, %s520_s15  }
 0x1db   :  { %506 = dma.done.wait [#allocation5], 512  }
 0x1dc   :  { %507 = vsyncadd [#allocation5], 4294966784 }
 0x1dd   :  { %332 = vsyncpa [#allocation4], 1 }
 0x1de   :  { %333 = vsyncpa [#allocation7], 1 }
 0x1df   :  { %334 = vsyncpa [#allocation5], 1 }

</bundles_post_ra>
